<compile_context>
chip_gen: v6e
topology: v6e:2x2x1
jax: 0.10.0
libtpu: 0.0.40
codegen_flags: <defaults>
</compile_context>

<pallas_src>
import numpy as np
import jax
import jax.numpy as jnp
from jax.experimental import pallas as pl
from jax.experimental.pallas import tpu as pltpu


def _pairwise_dist_kernel(row_ref, col_ref, out_ref):
    """row_ref: (3, TM) f32 -- rows 0..1 = (row, col) coords of this block's
                               "query" tokens, row 2 = CLS mask (0 at CLS, else 1).
       col_ref: (3, TN) f32 -- same, for this block's "key" tokens.
       out_ref: (2, TM, TN) f32 -- out[c,i,j] = m_i * m_j * (coord[c,i] - coord[c,j])."""
    r = row_ref[...]                                 # (3, TM)
    c = col_ref[...]                                 # (3, TN)
    diff = r[:2, :, None] - c[:2, None, :]           # (2, TM, TN)
    mask = r[2:3, :, None] * c[2:3, None, :]         # (1, TM, TN) -> zeroes CLS row/col
    out_ref[...] = diff * mask


def pallas_pairwise_distances(n_patches: int, *, tile_m: int = 256, tile_n: int = 512):
    """Pallas equivalent of Kernel.get_pairwise_distances, coordinate-major.

    Returns dists of shape (2, n_patches + 1, n_patches + 1), float32.
    (For typical ViT sizes this is a one-shot init-time constant; the tiled
     kernel only matters when (2,N,N) gets large.)"""
    # NOTE: the PyTorch reference assumes a square token grid.
    n_rows = n_cols = int(np.sqrt(n_patches))
    rows, cols = np.indices((n_rows, n_cols))
    token_idxs = np.stack([rows.flatten(), cols.flatten()], axis=0).astype(np.float32)  # (2, n)

    N = n_patches + 1
    # (3, N): rows 0..1 = padded coords (slot 0 = CLS, value ignored), row 2 = CLS mask.
    coords = np.zeros((3, N), dtype=np.float32)
    coords[:2, 1:] = token_idxs
    coords[2, 1:] = 1.0
    coords = jnp.asarray(coords)

    # (8,128)-friendly tiles; fall back to full extent for small N so the
    # BlockSpec divisibility rule ("divisible by (8,128) OR full extent") holds.
    TM = tile_m if N >= tile_m else N
    TN = tile_n if N >= tile_n else N
    grid = (pl.cdiv(N, TM), pl.cdiv(N, TN))

    out = pl.pallas_call(
        _pairwise_dist_kernel,
        out_shape=jax.ShapeDtypeStruct((2, N, N), jnp.float32),
        grid=grid,
        in_specs=[
            pl.BlockSpec((3, TM), lambda i, j: (0, i)),   # row ("query") coords + mask
            pl.BlockSpec((3, TN), lambda i, j: (0, j)),   # col ("key") coords + mask
        ],
        out_specs=pl.BlockSpec((2, TM, TN), lambda i, j: (0, i, j)),
        compiler_params=pltpu.CompilerParams(
            dimension_semantics=("parallel", "parallel")),
    )(coords, coords)
    return out


class PallasKernel:
    """JAX port of the (abstract) PyTorch `Kernel` module."""

    def __init__(self, config, img_size, norm=None):
        self.num_attention_heads = config["transformer"]["num_heads"]
        self.attention_head_size = int(config["hidden_size"] / self.num_attention_heads)
        ph, pw = config["patches"]["size"]
        n_patches = (img_size[0] // ph) * (img_size[1] // pw)
        # Lane-dense coordinate-major tensor (2, N, N) -- preferred downstream layout.
        self.dists_cmajor = pallas_pairwise_distances(n_patches)
        # PyTorch-layout copy (N, N, 2); single transpose done once at init.
        self.dists = jnp.transpose(self.dists_cmajor, (1, 2, 0))

    def forward(self, query):
        # TODO(synk): `forward` is @abstractmethod in the PyTorch source (subclasses map
        # query (b,h,n,hd) -> mask (b,h,n,n), sigmas (b,h,n,1)); nothing concrete to translate.
        raise NotImplementedError("Kernel.forward is abstract in the reference module.")


def _reference_dists(n_patches: int) -> np.ndarray:
    """Numpy reimplementation of the PyTorch get_pairwise_distances semantics."""
    n_rows = n_cols = int(np.sqrt(n_patches))
    rows, cols = np.indices((n_rows, n_cols))
    token_idxs = np.stack([rows.flatten(), cols.flatten()], axis=1).astype(np.float32)
    raw = token_idxs[:, None, :] - token_idxs[None, :, :]               # (n, n, 2)
    ref = np.zeros((n_patches + 1, n_patches + 1, 2), dtype=np.float32)
    ref[1:, 1:, :] = raw                                                # F.pad (0,0,1,0,1,0)
    return ref


if __name__ == "__main__":
    # Small config consistent with the module's __init__.
    config = {
        "hidden_size": 32,
        "transformer": {"num_heads": 4},
        "patches": {"size": (4, 4)},
    }
    img_size = (16, 16)  # -> n_patches = 16, token grid 4x4, dists: (17, 17, 2)

    kernel = PallasKernel(config, img_size)
    dists = jax.block_until_ready(kernel.dists)

    # Exact check against the PyTorch semantics (small, single-block path).
    np.testing.assert_allclose(np.asarray(dists), _reference_dists(16), rtol=0, atol=0)

    # Also exercise the tiled multi-block path (grid=(5,3) with partial edge blocks).
    big_cmajor = jax.block_until_ready(pallas_pairwise_distances(32 * 32))  # N = 1025
    np.testing.assert_allclose(
        np.asarray(jnp.transpose(big_cmajor, (1, 2, 0))),
        _reference_dists(32 * 32), rtol=0, atol=0)

    # Example query matching the documented forward signature (b, h, n, hd) -- unused
    # (forward is abstract) but built to pin down the implied shapes.
    key = jax.random.PRNGKey(0)
    b, h = 2, config["transformer"]["num_heads"]
    n = dists.shape[0]
    hd = kernel.attention_head_size
    query = jax.random.normal(key, (b, h, n, hd), dtype=jnp.float32)
    jax.block_until_ready(query)

    assert dists.shape == (n, n, 2) and dists.dtype == jnp.float32
    assert kernel.dists_cmajor.shape == (2, n, n)
    print("KERNEL_OK")
</pallas_src>

<mosaic_0001>
module attributes {stable_mosaic.version = 11 : i64} {
  func.func @_pairwise_dist_kernel(%arg0: i32, %arg1: i32, %arg2: memref<3x17xf32, #tpu.memory_space<vmem>>, %arg3: memref<3x17xf32, #tpu.memory_space<vmem>>, %arg4: memref<2x17x17xf32, #tpu.memory_space<vmem>>) attributes {dimension_semantics = [#tpu.dimension_semantics<parallel>, #tpu.dimension_semantics<parallel>], iteration_bounds = array<i64: 1, 1>, scalar_prefetch = 0 : i64, scratch_operands = 0 : i64, tpu.core_type = #tpu.core_type<tc>, window_params = [{transform_indices = @transform_0, window_bounds = array<i64: 3, 17>}, {transform_indices = @transform_1, window_bounds = array<i64: 3, 17>}, {transform_indices = @transform_2, window_bounds = array<i64: 2, 17, 17>}]} {
    %c0 = arith.constant 0 : index
    %c0_0 = arith.constant 0 : index
    %0 = vector.load %arg2[%c0, %c0_0] : memref<3x17xf32, #tpu.memory_space<vmem>>, vector<3x17xf32>
    %c0_1 = arith.constant 0 : index
    %c0_2 = arith.constant 0 : index
    %1 = vector.load %arg3[%c0_1, %c0_2] : memref<3x17xf32, #tpu.memory_space<vmem>>, vector<3x17xf32>
    %2 = vector.extract_strided_slice %0 {offsets = [0, 0], sizes = [2, 17], strides = [1, 1]} : vector<3x17xf32> to vector<2x17xf32>
    %3 = vector.shape_cast %2 : vector<2x17xf32> to vector<2x17x1xf32>
    %4 = vector.extract_strided_slice %1 {offsets = [0, 0], sizes = [2, 17], strides = [1, 1]} : vector<3x17xf32> to vector<2x17xf32>
    %5 = vector.shape_cast %4 : vector<2x17xf32> to vector<2x1x17xf32>
    %6 = vector.broadcast %3 : vector<2x17x1xf32> to vector<2x17x17xf32>
    %7 = vector.broadcast %5 : vector<2x1x17xf32> to vector<2x17x17xf32>
    %8 = arith.subf %6, %7 : vector<2x17x17xf32>
    %9 = vector.extract_strided_slice %0 {offsets = [2, 0], sizes = [1, 17], strides = [1, 1]} : vector<3x17xf32> to vector<1x17xf32>
    %10 = vector.shape_cast %9 : vector<1x17xf32> to vector<1x17x1xf32>
    %11 = vector.extract_strided_slice %1 {offsets = [2, 0], sizes = [1, 17], strides = [1, 1]} : vector<3x17xf32> to vector<1x17xf32>
    %12 = vector.shape_cast %11 : vector<1x17xf32> to vector<1x1x17xf32>
    %13 = vector.broadcast %10 : vector<1x17x1xf32> to vector<1x17x17xf32>
    %14 = vector.broadcast %12 : vector<1x1x17xf32> to vector<1x17x17xf32>
    %15 = arith.mulf %13, %14 : vector<1x17x17xf32>
    %16 = vector.broadcast %15 : vector<1x17x17xf32> to vector<2x17x17xf32>
    %17 = arith.mulf %8, %16 : vector<2x17x17xf32>
    %c0_3 = arith.constant 0 : index
    %c0_4 = arith.constant 0 : index
    %c0_5 = arith.constant 0 : index
    %18 = vector.load %arg4[%c0_3, %c0_4, %c0_5] : memref<2x17x17xf32, #tpu.memory_space<vmem>>, vector<2x17x17xf32>
    tpu.vector_store %arg4[%c0_3, %c0_4, %c0_5], %17 {strides = array<i32>} : memref<2x17x17xf32, #tpu.memory_space<vmem>>, vector<2x17x17xf32>,
    return
  }
  func.func @transform_0(%arg0: i32, %arg1: i32) -> (i32, i32) {
    %c0_i32 = arith.constant 0 : i32
    %c0_i32_0 = arith.constant 0 : i32
    return %c0_i32, %arg0 : i32, i32
  }
  func.func @transform_1(%arg0: i32, %arg1: i32) -> (i32, i32) {
    %c0_i32 = arith.constant 0 : i32
    %c0_i32_0 = arith.constant 0 : i32
    return %c0_i32, %arg1 : i32, i32
  }
  func.func @transform_2(%arg0: i32, %arg1: i32) -> (i32, i32, i32) {
    %c0_i32 = arith.constant 0 : i32
    %c0_i32_0 = arith.constant 0 : i32
    return %c0_i32, %arg0, %arg1 : i32, i32, i32
  }
}

</mosaic_0001>

<bundles_post_ra>
// kernel: tpu_custom_call.1
= control target key start
LH: loop header
LB: loop body
LE: loop exit
PB: predicated region body
PF: predicated region fallthrough
CT: control target
= control target key end

     0   :  { %7 = vsyncpa [#allocation3], 0  ;;  %s237_s0 = inlined_call_operand.hbm [shape: f32[3,17], index: 0, kind: input, shape index: {}]   ;;  %s238_s1 = inlined_call_operand.hbm [shape: f32[3,17], index: 1, kind: input, shape index: {}]   ;;  %s239_s2 = inlined_call_operand.vmem [shape: f32[2,17,17], index: 2, kind: output, shape index: {}]  }
   0x1   :  { %8 = vsyncpa [#allocation5], 0  ;;  %s195_s9 = smov [#allocation2]   ;;  %s196_s11 = smov [#allocation4]  }
   0x2   :  { %s15_s10 = sshll.u32 %s195_s9, 4  ;;  %s25_s12 = sshll.u32 %s196_s11, 4  ;;  %s16_s10 = int_to_ptr.vmem [resolvable:$true] %s15_s10  ;;  %s26_s12 = int_to_ptr.vmem [resolvable:$true] %s25_s12 }
   0x3   :  { %s159_s13 = scalar_lea.vmem %s16_s10, 64  ;;  %p164_p1 = scmp.lt.s32.totalorder %s16_s10, %s16_s10 }
   0x4   :  { %p160_p0 = scmp.ne.s32.totalorder %s16_s10, %s159_s13  ;;  %p165_p2 = scmp.lt.s32.totalorder %s159_s13, %s159_s13 }
   0x6   :  { %p166_p3 = por %p165_p2, %p164_p1 }
   0x8   :  { %p167_p4 = pnand %p166_p3, %p160_p0 }
   0xa   :  { %170 = shalt.err (!%p167_p4)
}
   0xb   :  { %18 = dma.hbm_to_vmem [thread:$0]  %s237_s0, 64, %s16_s10, [#allocation3]  }
   0xc   :  { %s179_s16 = scalar_lea.vmem %s26_s12, 64  ;;  %p184_p6 = scmp.lt.s32.totalorder %s26_s12, %s26_s12 }
   0xd   :  { %p180_p5 = scmp.ne.s32.totalorder %s26_s12, %s179_s16  ;;  %p185_p7 = scmp.lt.s32.totalorder %s179_s16, %s179_s16 }
   0xf   :  { %p186_p8 = por %p185_p7, %p184_p6 }
  0x11   :  { %p187_p9 = pnand %p186_p8, %p180_p5 }
  0x13   :  { %190 = shalt.err (!%p187_p9)
}
  0x14   :  { %28 = dma.hbm_to_vmem [thread:$0]  %s238_s1, 64, %s26_s12, [#allocation5]  }
  0x15   :  { %191 = dma.done.wait [#allocation3], 64  }
  0x16   :  { %192 = vsyncadd [#allocation3], 4294967232 }
  0x17   :  { %193 = dma.done.wait [#allocation5], 64  }
  0x18   :  { %194 = vsyncadd [#allocation5], 4294967232  ;;  %v37_v0 = vlaneseq  ;;  %v197_v1 = vmov 1966171168   ;;  %v35_v8 = vld [vmem:[#allocation2] sm:$0x7] }
  0x19   :  { %v69_v2 = vunpack.c.l.s4 %v197_v1  ;;  %v36_v9 = vld [vmem:[#allocation4] sm:$0x7]  ;;  %vm134_vm0 = vcmask 138240   ;;  %vm137_vm1 = vcmask 131072  }
  0x1a   :  { %v38_v3 = vshrl.u32 %v37_v0, 7 }
  0x1b   :  { %v70_v4 = vunpack.c.0.s8 %v69_v2 }
  0x1c   :  { %v39_v5 = vsub.s32 0, %v38_v3  ;;  %v54_v7 = vsub.s32 1, %v38_v3  ;;  %v108_v17 = vsub.s32 2, %v38_v3 }
  0x1d   :  { %v73_v6 = vsub.s32 %v70_v4, %v38_v3 }
  0x1e   :  { %v40_v10 = vrot.slane %v35_v8, %v39_v5  ;;  %v55_v12 = vrot.slane %v35_v8, %v54_v7  ;;  %v109_v19 = vrot.slane %v35_v8, %v108_v17  ;;  %v124_v26 = vrot.slane %v36_v9, %v108_v17 }
  0x1f   :  { %v74_v11 = vrot.slane %v36_v9, %v73_v6 }
  0x20   :  { %50 = vbcast.lane.b32.xlu1 %v40_v10, 272  ;;  %42 = vbcast.lane.b32.xlu0 %v40_v10, 256 }
  0x21   :  { %v82_v13 = vrot.slane %v74_v11, %v73_v6  ;;  %v75_v14 = vcombine.high %v74_v11, %v74_v11 }
  0x23   :  { %v93_v15 = vrot.slane %v82_v13, %v39_v5  ;;  %v89_v16 = vrot.slane %v75_v14, %v73_v6 }
  0x24   :  { %57 = vbcast.lane.b32.xlu1 %v55_v12, 256  ;;  %46 = vbcast.lane.b32.xlu0 %v40_v10, 264 }
  0x25   :  { %v97_v18 = vrot.slane %v89_v16, %v39_v5 }
  0x28   :  { %65 = vbcast.lane.b32.xlu1 %v55_v12, 272  ;;  %61 = vbcast.lane.b32.xlu0 %v55_v12, 264 }
  0x2c   :  { %115 = vbcast.lane.b32.xlu1 %v109_v19, 264  ;;  %111 = vbcast.lane.b32.xlu0 %v109_v19, 256 }
  0x30   :  { %119 = vbcast.lane.b32.xlu0 %v109_v19, 272 }
  0x92   :  { %v51_v20 = vpop.permute.xlu1 %50  ;;  %v43_v21 = vpop.permute.xlu0 %42 }
  0x93   :  { %v100_v27 = vsub.f32 %v43_v21, %v93_v15  ;;  %v102_v40 = vsub.f32 %v51_v20, %v93_v15 }
  0x96   :  { %v58_v22 = vpop.permute.xlu1 %57  ;;  %v47_v23 = vpop.permute.xlu0 %46 }
  0x97   :  { %v103_v28 = vsub.f32 %v58_v22, %v97_v18  ;;  %v101_v31 = vsub.f32 %v47_v23, %v93_v15 }
  0x9a   :  { %v66_v24 = vpop.permute.xlu1 %65  ;;  %v62_v25 = vpop.permute.xlu0 %61 }
  0x9b   :  { %v104_v32 = vsub.f32 %v62_v25, %v97_v18  ;;  %v105_v41 = vsub.f32 %v66_v24, %v97_v18 }
  0x9e   :  { %v116_v29 = vpop.permute.xlu1 %115  ;;  %v112_v30 = vpop.permute.xlu0 %111 }
  0x9f   :  { %v126_v33 = vmul.f32 %v124_v26, %v116_v29  ;;  %v125_v34 = vmul.f32 %v124_v26, %v112_v30 }
  0xa1   :  { %v129_v35 = vmul.f32 %v126_v33, %v101_v31  ;;  %v132_v36 = vmul.f32 %v126_v33, %v104_v32  ;;  %v128_v37 = vmul.f32 %v125_v34, %v100_v27  ;;  %v131_v38 = vmul.f32 %v125_v34, %v103_v28 }
  0xa2   :  { %v120_v39 = vpop.permute.xlu0 %119 }
  0xa3   :  { %136 = vst.msk [vmem:[%s239_s2 + $0x8] sm:$0xff] %vm134_vm0, %v129_v35  ;;  %140 = vst.msk [vmem:[%s239_s2 + $0x20] sm:$0xff] %vm134_vm0, %v132_v36  ;;  %v127_v42 = vmul.f32 %v124_v26, %v120_v39 }
  0xa4   :  { %135 = vst.msk [vmem:[%s239_s2] sm:$0xff] %vm134_vm0, %v128_v37  ;;  %139 = vst.msk [vmem:[%s239_s2 + $0x18] sm:$0xff] %vm134_vm0, %v131_v38 }
  0xa5   :  { %v130_v43 = vmul.f32 %v127_v42, %v102_v40  ;;  %v133_v44 = vmul.f32 %v127_v42, %v105_v41 }
  0xa7   :  { %138 = vst.msk [vmem:[%s239_s2 + $0x10] sm:$0x1] %vm137_vm1, %v130_v43  ;;  %141 = vst.msk [vmem:[%s239_s2 + $0x28] sm:$0x1] %vm137_vm1, %v133_v44 }
  0xa8   :  { %146 = vsyncpa [#allocation3], 1 }
  0xa9   :  { %147 = vsyncpa [#allocation5], 1 }

</bundles_post_ra>
